<compile_context>
chip_gen: v5e
topology: v5e:2x2
jax: 0.10.0
libtpu: 0.0.40
codegen_flags: <defaults>
</compile_context>

<pallas_src>
import jax
import jax.numpy as jnp
from jax.experimental import pallas as pl
from jax.experimental.pallas import tpu as pltpu

D_IN = 768         # BERT hidden size (fixed by module)
H = 50             # n_hidden default
D_OUT = 2          # out_dim default (architecture='classifier')
H_PAD = 128        # H padded to the 128-lane vreg width
OUT_PAD = 128      # D_OUT padded to the 128-lane vreg width
TILE_B_MAX = 2048  # batch tile cap: multiple of 16, ~15 MiB VMEM footprint


def _round_up(x, m):
    return ((x + m - 1) // m) * m


def _pick_tile_b(B):
    """Batch tile: whole batch in one step when small; otherwise split into
    >= 2 steps (v7x megacore) with tiles capped at TILE_B_MAX rows."""
    if B <= 512:
        return _round_up(max(B, 1), 16)
    half = _round_up(-(-B // 2), 16)  # cdiv(B, 2) rounded to sublane packing
    return min(TILE_B_MAX, half)


def classifier_head_kernel(x_ref, w1_ref, b1_ref, w2_ref, b2_ref, out_ref):
    """Two-layer MLP head: ReLU(x @ W1 + b1) @ W2 + b2 (lane-dense, padded).

    x_ref:  (TILE_B, D_IN)    f32   (cast to bf16 in-kernel for the MXU)
    w1_ref: (D_IN, H_PAD)     bf16  (zero-padded beyond column H)
    b1_ref: (1, H_PAD)        f32   (zero-padded beyond column H)
    w2_ref: (H_PAD, OUT_PAD)  bf16  (zero-padded beyond row H / column D_OUT)
    b2_ref: (1, OUT_PAD)      f32   (zero-padded beyond column D_OUT)
    out_ref:(TILE_B, OUT_PAD) f32
    """
    # bf16 MXU operands with f32 accumulation; the cast rides the VPU slack.
    x = x_ref[...].astype(jnp.bfloat16)
    h = jnp.dot(x, w1_ref[...], preferred_element_type=jnp.float32)
    h = jnp.maximum(h + b1_ref[...], 0.0)
    # nn.Dropout is identity at inference time.
    logits = jnp.dot(h.astype(jnp.bfloat16), w2_ref[...],
                     preferred_element_type=jnp.float32) + b2_ref[...]
    out_ref[...] = logits


def prepare_head_params(w1, b1, w2, b2):
    """One-time weight prep (outside the hot path): pad the narrow H / D_OUT
    axes to 128 lanes and store matmul operands as bf16 at rest."""
    w1p = jnp.pad(w1.astype(jnp.bfloat16), ((0, 0), (0, H_PAD - H)))
    b1p = jnp.pad(b1.astype(jnp.float32), ((0, 0), (0, H_PAD - H)))
    w2p = jnp.pad(w2.astype(jnp.bfloat16), ((0, H_PAD - H), (0, OUT_PAD - D_OUT)))
    b2p = jnp.pad(b2.astype(jnp.float32), ((0, 0), (0, OUT_PAD - D_OUT)))
    return w1p, b1p, w2p, b2p


def bert_classifier_forward(last_hidden_state, w1p, b1p, w2p, b2p):
    """Mirrors BertClassifier.forward (classifier architecture, no claims).

    last_hidden_state: (B, S, D_IN) -- stand-in for the external BERT encoder
    output.  Returns (logits (B, D_OUT), cls (B, D_IN)).
    """
    # TODO(synk): the BERT encoder itself is an external nn.Module passed into
    # __init__ and is not reproducible from this file; its output is taken as
    # an input here.
    cls = last_hidden_state[:, 0, :]  # (B, D_IN); returned by the module
    B = cls.shape[0]

    tile_b = _pick_tile_b(B)
    grid = (pl.cdiv(B, tile_b),)  # partial tail block handled by Pallas

    logits_padded = pl.pallas_call(
        classifier_head_kernel,
        out_shape=jax.ShapeDtypeStruct((B, OUT_PAD), jnp.float32),
        grid_spec=pltpu.PrefetchScalarGridSpec(
            num_scalar_prefetch=0,
            grid=grid,
            in_specs=[
                # Streaming operand. If DMA is still exposed at large B, add
                # pipeline_mode=pl.Buffered(3) here (and only here).
                pl.BlockSpec((tile_b, D_IN), lambda i: (i, 0)),    # x tile (f32)
                pl.BlockSpec((D_IN, H_PAD), lambda i: (0, 0)),     # W1 (resident)
                pl.BlockSpec((1, H_PAD), lambda i: (0, 0)),        # b1
                pl.BlockSpec((H_PAD, OUT_PAD), lambda i: (0, 0)),  # W2 (resident)
                pl.BlockSpec((1, OUT_PAD), lambda i: (0, 0)),      # b2
            ],
            out_specs=pl.BlockSpec((tile_b, OUT_PAD), lambda i: (i, 0)),
        ),
        compiler_params=pltpu.CompilerParams(
            # Batch axis is independent -> shard across v7x's two TensorCores.
            dimension_semantics=("parallel",),
            # ~15 MiB worst case (double-buffered f32 x/out tiles at
            # tile_b=2048 + resident weights); 32 MiB leaves headroom and is
            # within the scoped default on every generation.
            vmem_limit_bytes=32 * 1024 * 1024,
        ),
    )(cls, w1p, b1p, w2p, b2p)

    logits = logits_padded[:, :D_OUT]
    return logits, cls


def init_params(key):
    """Deterministic init matching nn.Linear shapes (uniform +-1/sqrt(fan_in))."""
    k1, k2, k3, k4 = jax.random.split(key, 4)
    lim1 = 1.0 / jnp.sqrt(jnp.float32(D_IN))
    lim2 = 1.0 / jnp.sqrt(jnp.float32(H))
    w1 = jax.random.uniform(k1, (D_IN, H), jnp.float32, -lim1, lim1)
    b1 = jax.random.uniform(k2, (1, H), jnp.float32, -lim1, lim1)
    w2 = jax.random.uniform(k3, (H, D_OUT), jnp.float32, -lim2, lim2)
    b2 = jax.random.uniform(k4, (1, D_OUT), jnp.float32, -lim2, lim2)
    return w1, b1, w2, b2


if __name__ == "__main__":
    key = jax.random.PRNGKey(0)
    kx, kp = jax.random.split(key)

    B, S = 2, 8  # small batch / sequence; only the CLS token feeds the head
    # Synthetic stand-in for outputs.last_hidden_state from the BERT encoder.
    last_hidden_state = jax.random.normal(kx, (B, S, D_IN), jnp.float32)

    w1, b1, w2, b2 = init_params(kp)
    # Weight padding / bf16 cast hoisted out of the per-call wrapper.
    w1p, b1p, w2p, b2p = prepare_head_params(w1, b1, w2, b2)

    fwd = jax.jit(bert_classifier_forward)
    logits, cls = fwd(last_hidden_state, w1p, b1p, w2p, b2p)
    jax.block_until_ready((logits, cls))

    # Reference check in plain JAX with the same bf16-operand / f32-accumulate
    # numerics as the kernel.
    cls_ref = last_hidden_state[:, 0, :]
    h_ref = jnp.maximum(
        jnp.dot(cls_ref.astype(jnp.bfloat16), w1.astype(jnp.bfloat16),
                preferred_element_type=jnp.float32) + b1,
        0.0,
    )
    logits_ref = jnp.dot(h_ref.astype(jnp.bfloat16), w2.astype(jnp.bfloat16),
                         preferred_element_type=jnp.float32) + b2

    assert logits.shape == (B, D_OUT)
    assert cls.shape == (B, D_IN)
    assert jnp.allclose(cls, cls_ref)
    assert jnp.allclose(logits, logits_ref, atol=5e-3, rtol=5e-3)

    print("KERNEL_OK")
</pallas_src>

<mosaic_0001>
module attributes {stable_mosaic.version = 11 : i64} {
  func.func @classifier_head_kernel(%arg0: i32, %arg1: memref<16x768xf32, #tpu.memory_space<vmem>>, %arg2: memref<768x128xbf16, #tpu.memory_space<vmem>>, %arg3: memref<1x128xf32, #tpu.memory_space<vmem>>, %arg4: memref<128x128xbf16, #tpu.memory_space<vmem>>, %arg5: memref<1x128xf32, #tpu.memory_space<vmem>>, %arg6: memref<16x128xf32, #tpu.memory_space<vmem>>) attributes {dimension_semantics = [#tpu.dimension_semantics<parallel>], iteration_bounds = array<i64: 1>, scalar_prefetch = 0 : i64, scratch_operands = 0 : i64, tpu.core_type = #tpu.core_type<tc>, window_params = [{transform_indices = @transform_0, window_bounds = array<i64: 16, 768>}, {pipeline_mode = #tpu.pipeline_mode<synchronous>, transform_indices = @transform_1, window_bounds = array<i64: 768, 128>}, {pipeline_mode = #tpu.pipeline_mode<synchronous>, transform_indices = @transform_2, window_bounds = array<i64: 1, 128>}, {pipeline_mode = #tpu.pipeline_mode<synchronous>, transform_indices = @transform_3, window_bounds = array<i64: 128, 128>}, {pipeline_mode = #tpu.pipeline_mode<synchronous>, transform_indices = @transform_4, window_bounds = array<i64: 1, 128>}, {transform_indices = @transform_5, window_bounds = array<i64: 16, 128>}]} {
    %c0 = arith.constant 0 : index
    %c0_0 = arith.constant 0 : index
    %0 = vector.load %arg1[%c0, %c0_0] : memref<16x768xf32, #tpu.memory_space<vmem>>, vector<16x768xf32>
    %1 = arith.truncf %0 : vector<16x768xf32> to vector<16x768xbf16>
    %c0_1 = arith.constant 0 : index
    %c0_2 = arith.constant 0 : index
    %2 = vector.load %arg2[%c0_1, %c0_2] : memref<768x128xbf16, #tpu.memory_space<vmem>>, vector<768x128xbf16>
    %cst = arith.constant dense<0.000000e+00> : vector<16x128xf32>
    %3 = tpu.matmul %1, %2, %cst {dimension_numbers = #tpu.dot_dimension_numbers<[1], [0], [0], [1], [0, 0, 1, 1], [], []>} : vector<16x768xbf16>, vector<768x128xbf16>, vector<16x128xf32> -> vector<16x128xf32>
    %c0_3 = arith.constant 0 : index
    %c0_4 = arith.constant 0 : index
    %4 = vector.load %arg3[%c0_3, %c0_4] : memref<1x128xf32, #tpu.memory_space<vmem>>, vector<1x128xf32>
    %5 = vector.broadcast %4 : vector<1x128xf32> to vector<16x128xf32>
    %6 = arith.addf %3, %5 : vector<16x128xf32>
    %cst_5 = arith.constant 0.000000e+00 : f32
    %7 = vector.broadcast %cst_5 : f32 to vector<16x128xf32>
    %8 = arith.maximumf %6, %7 : vector<16x128xf32>
    %9 = arith.truncf %8 : vector<16x128xf32> to vector<16x128xbf16>
    %c0_6 = arith.constant 0 : index
    %c0_7 = arith.constant 0 : index
    %10 = vector.load %arg4[%c0_6, %c0_7] : memref<128x128xbf16, #tpu.memory_space<vmem>>, vector<128x128xbf16>
    %cst_8 = arith.constant dense<0.000000e+00> : vector<16x128xf32>
    %11 = tpu.matmul %9, %10, %cst_8 {dimension_numbers = #tpu.dot_dimension_numbers<[1], [0], [0], [1], [0, 0, 1, 1], [], []>} : vector<16x128xbf16>, vector<128x128xbf16>, vector<16x128xf32> -> vector<16x128xf32>
    %c0_9 = arith.constant 0 : index
    %c0_10 = arith.constant 0 : index
    %12 = vector.load %arg5[%c0_9, %c0_10] : memref<1x128xf32, #tpu.memory_space<vmem>>, vector<1x128xf32>
    %13 = vector.broadcast %12 : vector<1x128xf32> to vector<16x128xf32>
    %14 = arith.addf %11, %13 : vector<16x128xf32>
    %c0_11 = arith.constant 0 : index
    %c0_12 = arith.constant 0 : index
    %15 = vector.load %arg6[%c0_11, %c0_12] : memref<16x128xf32, #tpu.memory_space<vmem>>, vector<16x128xf32>
    tpu.vector_store %arg6[%c0_11, %c0_12], %14 {strides = array<i32>} : memref<16x128xf32, #tpu.memory_space<vmem>>, vector<16x128xf32>,
    return
  }
  func.func @transform_0(%arg0: i32) -> (i32, i32) {
    %c0_i32 = arith.constant 0 : i32
    %c0_i32_0 = arith.constant 0 : i32
    return %arg0, %c0_i32 : i32, i32
  }
  func.func @transform_1(%arg0: i32) -> (i32, i32) {
    %c0_i32 = arith.constant 0 : i32
    %c0_i32_0 = arith.constant 0 : i32
    %c0_i32_1 = arith.constant 0 : i32
    return %c0_i32, %c0_i32_0 : i32, i32
  }
  func.func @transform_2(%arg0: i32) -> (i32, i32) {
    %c0_i32 = arith.constant 0 : i32
    %c0_i32_0 = arith.constant 0 : i32
    %c0_i32_1 = arith.constant 0 : i32
    return %c0_i32, %c0_i32_0 : i32, i32
  }
  func.func @transform_3(%arg0: i32) -> (i32, i32) {
    %c0_i32 = arith.constant 0 : i32
    %c0_i32_0 = arith.constant 0 : i32
    %c0_i32_1 = arith.constant 0 : i32
    return %c0_i32, %c0_i32_0 : i32, i32
  }
  func.func @transform_4(%arg0: i32) -> (i32, i32) {
    %c0_i32 = arith.constant 0 : i32
    %c0_i32_0 = arith.constant 0 : i32
    %c0_i32_1 = arith.constant 0 : i32
    return %c0_i32, %c0_i32_0 : i32, i32
  }
  func.func @transform_5(%arg0: i32) -> (i32, i32) {
    %c0_i32 = arith.constant 0 : i32
    %c0_i32_0 = arith.constant 0 : i32
    return %arg0, %c0_i32 : i32, i32
  }
}

</mosaic_0001>

<bundles_post_ra>
// kernel: bert_classifier_forward.1
= control target key start
LH: loop header
LB: loop body
LE: loop exit
PB: predicated region body
PF: predicated region fallthrough
CT: control target
= control target key end

     0   :  { %10 = vsyncpa [#allocation3], 0  ;;  %s1184_s0 = inlined_call_operand.vmem [shape: f32[2,768], index: 0, kind: input, shape index: {}]   ;;  %s1185_s1 = inlined_call_operand.hbm [shape: bf16[768,128], index: 1, kind: input, shape index: {}]   ;;  %s1186_s2 = inlined_call_operand.vmem [shape: f32[1,128], index: 2, kind: input, shape index: {}]   ;;  %s1187_s3 = inlined_call_operand.hbm [shape: bf16[128,128], index: 3, kind: input, shape index: {}]   ;;  %s1188_s4 = inlined_call_operand.vmem [shape: f32[1,128], index: 4, kind: input, shape index: {}]   ;;  %s1189_s5 = inlined_call_operand.hbm [shape: f32[2,128], index: 5, kind: output, shape index: {}]  }
   0x1   :  { %11 = vsyncpa [#allocation6], 0 }
   0x2   :  { %12 = vsyncpa [#allocation4], 0  ;;  %s19_s20 = sshll.u32 %s1185_s1, 4  ;;  %s1084_s21 = smov [#allocation2]   ;;  %s20_s20 = int_to_ptr.hbm [resolvable:$true] %s19_s20 }
   0x3   :  { %s21_s22 = sshll.u32 %s1084_s21, 4  ;;  %s34_s25 = sshll.u32 %s1187_s3, 4  ;;  %s22_s22 = int_to_ptr.vmem [resolvable:$true] %s21_s22  ;;  %s35_s25 = int_to_ptr.hbm [resolvable:$true] %s34_s25 }
   0x4   :  { %s1085_s26 = smov 64   ;;  %s1086_s27 = smov 4  }
   0x5   :  { %27 = dma.hbm_to_vmem [thread:$0]  %s20_s20, 6144, %s22_s22, [#allocation3], %s1085_s26, %s1085_s26, %s1086_s27  }
   0x6   :  { %s1087_s28 = smov [#allocation5]  }
   0x7   :  { %s36_s29 = sshll.u32 %s1087_s28, 4  ;;  %s37_s29 = int_to_ptr.vmem [resolvable:$true] %s36_s29 }
   0x8   :  { %42 = dma.hbm_to_vmem [thread:$0]  %s35_s25, 1024, %s37_s29, [#allocation6], %s1085_s26, %s1085_s26, %s1086_s27  }
   0x9   :  { %1078 = dma.done.wait [#allocation3], 6144  }
   0xa   :  { %1079 = vsyncadd [#allocation3], 4294961152 }
   0xb   :  { %1080 = dma.done.wait [#allocation6], 1024  }
   0xc   :  { %1081 = vsyncadd [#allocation6], 4294966272  ;;  %v948_v0 = vld [vmem:[#allocation2 + $0x38] sm:$0xff]  ;;  %v947_v4 = vld [vmem:[#allocation2 + $0x30] sm:$0xff] }
   0xd   :  { %v956_v1 = vld [vmem:[#allocation2 + $0x78] sm:$0xff]  ;;  %526 = vmatpush.bf16.msra.mxu0 %v948_v0  ;;  %v955_v5 = vld [vmem:[#allocation2 + $0x70] sm:$0xff]  ;;  %v946_v8 = vld [vmem:[#allocation2 + $0x28] sm:$0xff] }
   0xe   :  { %v964_v2 = vld [vmem:[#allocation2 + $0xb8] sm:$0xff]  ;;  %540 = vmatpush.bf16.msra.mxu1 %v956_v1  ;;  %v963_v6 = vld [vmem:[#allocation2 + $0xb0] sm:$0xff]  ;;  %v954_v9 = vld [vmem:[#allocation2 + $0x68] sm:$0xff] }
   0xf   :  { %v972_v3 = vld [vmem:[#allocation2 + $0xf8] sm:$0xff]  ;;  %554 = vmatpush.bf16.msra.mxu2 %v964_v2  ;;  %v971_v7 = vld [vmem:[#allocation2 + $0xf0] sm:$0xff]  ;;  %v962_v10 = vld [vmem:[#allocation2 + $0xa8] sm:$0xff] }
  0x10   :  { %568 = vmatpush.bf16.msra.mxu3 %v972_v3  ;;  %v970_v11 = vld [vmem:[#allocation2 + $0xe8] sm:$0xff]  ;;  %v945_v12 = vld [vmem:[#allocation2 + $0x20] sm:$0xff]  ;;  %v53_v16 = vld [vmem:[%s1184_s0] sm:$0xff] }
  0x11   :  { %527 = vmatpush.bf16.msra.mxu0 %v947_v4  ;;  %v953_v13 = vld [vmem:[#allocation2 + $0x60] sm:$0xff]  ;;  %v57_v18 = vld [vmem:[%s1184_s0 + $0x18] sm:$0xff]  ;;  %85 = vst [vmem:[#allocation1] ss:$4 sm:$0xff] %v53_v16  ;;  %v944_v20 = vld [vmem:[#allocation2 + $0x18] sm:$0xff] }
  0x12   :  { %541 = vmatpush.bf16.msra.mxu1 %v955_v5  ;;  %v961_v14 = vld [vmem:[#allocation2 + $0xa0] sm:$0xff]  ;;  %v952_v21 = vld [vmem:[#allocation2 + $0x58] sm:$0xff]  ;;  %89 = vst [vmem:[#allocation1 + $0x2] ss:$4 sm:$0xff] %v57_v18  ;;  %v943_v24 = vld [vmem:[#allocation2 + $0x10] sm:$0xff] }
  0x13   :  { %555 = vmatpush.bf16.msra.mxu2 %v963_v6  ;;  %v969_v15 = vld [vmem:[#allocation2 + $0xe0] sm:$0xff]  ;;  %v960_v22 = vld [vmem:[#allocation2 + $0x98] sm:$0xff]  ;;  %v951_v25 = vld [vmem:[#allocation2 + $0x50] sm:$0xff] }
  0x14   :  { %569 = vmatpush.bf16.msra.mxu3 %v971_v7  ;;  %v55_v17 = vld [vmem:[%s1184_s0 + $0xc] sm:$0xff]  ;;  %v59_v19 = vld [vmem:[%s1184_s0 + $0x24] sm:$0xff]  ;;  %v56_v27 = vld [vmem:[%s1184_s0 + $0x14] sm:$0xf] }
  0x15   :  { %528 = vmatpush.bf16.msra.mxu0 %v946_v8  ;;  %87 = vst [vmem:[#allocation1 + $0x1] ss:$4 sm:$0xff] %v55_v17  ;;  %v968_v23 = vld [vmem:[#allocation2 + $0xd8] sm:$0xff]  ;;  %v54_v26 = vld [vmem:[%s1184_s0 + $0x8] sm:$0xf]  ;;  %v959_v29 = vld [vmem:[#allocation2 + $0x90] sm:$0xff] }
  0x16   :  { %542 = vmatpush.bf16.msra.mxu1 %v954_v9  ;;  %91 = vst [vmem:[#allocation1 + $0x3] ss:$4 sm:$0xff] %v59_v19  ;;  %v58_v28 = vld [vmem:[%s1184_s0 + $0x20] sm:$0xf]  ;;  %v967_v30 = vld [vmem:[#allocation2 + $0xd0] sm:$0xff]  ;;  %v942_v32 = vld [vmem:[#allocation2 + $0x8] sm:$0xff] }
  0x17   :  { %556 = vmatpush.bf16.msra.mxu2 %v962_v10  ;;  %93 = vst [vmem:[#allocation1 + $0x20] ss:$4 sm:$0xff] %v54_v26  ;;  %v60_v31 = vld [vmem:[%s1184_s0 + $0x2c] sm:$0xf]  ;;  %v950_v33 = vld [vmem:[#allocation2 + $0x48] sm:$0xff]  ;;  %v63_v37 = vld [vmem:[%s1184_s0 + $0x3c] sm:$0xff] }
  0x18   :  { %570 = vmatpush.bf16.msra.mxu3 %v970_v11  ;;  %95 = vst [vmem:[#allocation1 + $0x21] ss:$4 sm:$0xff] %v56_v27  ;;  %v958_v34 = vld [vmem:[#allocation2 + $0x88] sm:$0xff]  ;;  %v65_v38 = vld [vmem:[%s1184_s0 + $0x48] sm:$0xff]  ;;  %v980_v46 = vld [vmem:[#allocation2 + $0x138] sm:$0xff] }
  0x19   :  { %529 = vmatpush.bf16.msra.mxu0 %v945_v12  ;;  %97 = vst [vmem:[#allocation1 + $0x22] ss:$4 sm:$0xff] %v58_v28  ;;  %v966_v35 = vld [vmem:[#allocation2 + $0xc8] sm:$0xff]  ;;  %v941_v43 = vld [vmem:[#allocation2] sm:$0xff]  ;;  %v988_v47 = vld [vmem:[#allocation2 + $0x178] sm:$0xff] }
  0x1a   :  { %543 = vmatpush.bf16.msra.mxu1 %v953_v13  ;;  %v61_v36 = vld [vmem:[%s1184_s0 + $0x30] sm:$0xff]  ;;  %99 = vst [vmem:[#allocation1 + $0x23] ss:$4 sm:$0xff] %v60_v31  ;;  %v949_v45 = vld [vmem:[#allocation2 + $0x40] sm:$0xff]  ;;  %v62_v50 = vld [vmem:[%s1184_s0 + $0x38] sm:$0xf] }
  0x1b   :  { %557 = vmatpush.bf16.msra.mxu2 %v961_v14  ;;  %v67_v44 = vld [vmem:[%s1184_s0 + $0x54] sm:$0xff]  ;;  %v957_v48 = vld [vmem:[#allocation2 + $0x80] sm:$0xff]  ;;  %v64_v51 = vld [vmem:[%s1184_s0 + $0x44] sm:$0xf] }
  0x1c   :  { %571 = vmatpush.bf16.msra.mxu3 %v969_v15  ;;  %v965_v49 = vld [vmem:[#allocation2 + $0xc0] sm:$0xff]  ;;  %v66_v52 = vld [vmem:[%s1184_s0 + $0x50] sm:$0xf]  ;;  %v68_v55 = vld [vmem:[%s1184_s0 + $0x5c] sm:$0xf] }
  0x1d   :  { %530 = vmatpush.bf16.msra.mxu0 %v944_v20  ;;  %v100_v39 = vld.sshfl [vmem:[#allocation1] sm:$0xff pattern:$0x73625140]  ;;  %v101_v40 = vld.sshfl [vmem:[#allocation1 + $0x8] sm:$0xff pattern:$0x73625140] }
  0x1e   :  { %544 = vmatpush.bf16.msra.mxu1 %v952_v21  ;;  %v102_v41 = vld.sshfl [vmem:[#allocation1 + $0x10] sm:$0xff pattern:$0x73625140]  ;;  %v103_v42 = vld.sshfl [vmem:[#allocation1 + $0x18] sm:$0xff pattern:$0x73625140] }
  0x1f   :  { %558 = vmatpush.bf16.msra.mxu2 %v960_v22  ;;  %106 = vst [vmem:[#allocation1] ss:$4 sm:$0xff] %v61_v36  ;;  %v979_v56 = vld [vmem:[#allocation2 + $0x130] sm:$0xff]  ;;  %v978_v58 = vld [vmem:[#allocation2 + $0x128] sm:$0xff]  ;;  %v977_v4 = vld [vmem:[#allocation2 + $0x120] sm:$0xff] }
  0x20   :  { %572 = vmatpush.bf16.msra.mxu3 %v968_v23  ;;  %107 = vst [vmem:[#allocation1 + $0x1] ss:$4 sm:$0xff] %v63_v37  ;;  %v987_v57 = vld [vmem:[#allocation2 + $0x170] sm:$0xff]  ;;  %v986_v59 = vld [vmem:[#allocation2 + $0x168] sm:$0xff]  ;;  %v985_v5 = vld [vmem:[#allocation2 + $0x160] sm:$0xff] }
  0x21   :  { %531 = vmatpush.bf16.msra.mxu0 %v943_v24  ;;  %108 = vst [vmem:[#allocation1 + $0x2] ss:$4 sm:$0xff] %v65_v38  ;;  %v104_v53 = vld.sshfl [vmem:[#allocation1 + $0x20] sm:$0xff pattern:$0x73625140]  ;;  %v975_v8 = vld [vmem:[#allocation2 + $0x110] sm:$0xff] }
  0x22   :  { %545 = vmatpush.bf16.msra.mxu1 %v951_v25  ;;  %109 = vst [vmem:[#allocation1 + $0x3] ss:$4 sm:$0xff] %v67_v44  ;;  %v105_v54 = vld.sshfl [vmem:[#allocation1 + $0x28] sm:$0xff pattern:$0x73625140]  ;;  %v976_v6 = vld [vmem:[#allocation2 + $0x118] sm:$0xff] }
  0x23   :  { %559 = vmatpush.bf16.msra.mxu2 %v959_v29  ;;  %110 = vst [vmem:[#allocation1 + $0x20] ss:$4 sm:$0xff] %v62_v50  ;;  %v984_v7 = vld [vmem:[#allocation2 + $0x158] sm:$0xff]  ;;  %v983_v9 = vld [vmem:[#allocation2 + $0x150] sm:$0xff]  ;;  %v974_v10 = vld [vmem:[#allocation2 + $0x108] sm:$0xff] }
  0x24   :  { %573 = vmatpush.bf16.msra.mxu3 %v967_v30  ;;  %111 = vst [vmem:[#allocation1 + $0x21] ss:$4 sm:$0xff] %v64_v51  ;;  %v982_v11 = vld [vmem:[#allocation2 + $0x148] sm:$0xff]  ;;  %v973_v12 = vld [vmem:[#allocation2 + $0x100] sm:$0xff]  ;;  %v996_v18 = vld [vmem:[#allocation5 + $0x38] sm:$0xff] }
  0x25   :  { %532 = vmatpush.bf16.msra.mxu0 %v942_v32  ;;  %112 = vst [vmem:[#allocation1 + $0x22] ss:$4 sm:$0xff] %v66_v52  ;;  %v981_v14 = vld [vmem:[#allocation2 + $0x140] sm:$0xff]  ;;  %v995_v19 = vld [vmem:[#allocation5 + $0x30] sm:$0xff]  ;;  %v994_v20 = vld [vmem:[#allocation5 + $0x28] sm:$0xff] }
  0x26   :  { %546 = vmatpush.bf16.msra.mxu1 %v950_v33  ;;  %113 = vst [vmem:[#allocation1 + $0x23] ss:$4 sm:$0xff] %v68_v55  ;;  %v993_v21 = vld [vmem:[#allocation5 + $0x20] sm:$0xff]  ;;  %v992_v22 = vld [vmem:[#allocation5 + $0x18] sm:$0xff]  ;;  %v991_v23 = vld [vmem:[#allocation5 + $0x10] sm:$0xff] }
  0x27   :  { %560 = vmatpush.bf16.msra.mxu2 %v958_v34  ;;  %v990_v24 = vld [vmem:[#allocation5 + $0x8] sm:$0xff]  ;;  %v989_v26 = vld [vmem:[#allocation5] sm:$0xff]  ;;  %v1004_v28 = vld [vmem:[%s1186_s2] ss:$0 sm:$0xff] }
  0x28   :  { %574 = vmatpush.bf16.msra.mxu3 %v966_v35 }
  0x29   :  { %533 = vmatpush.bf16.msra.mxu0 %v941_v43  ;;  %v116_v60 = vld.sshfl [vmem:[#allocation1 + $0x10] sm:$0xff pattern:$0x73625140]  ;;  %v114_v61 = vld.sshfl [vmem:[#allocation1] sm:$0xff pattern:$0x73625140] }
  0x2a   :  { %547 = vmatpush.bf16.msra.mxu1 %v949_v45  ;;  %v134_v62 = vpack.c.bf16 %v116_v60, %v102_v41  ;;  %v132_v63 = vpack.c.bf16 %v114_v61, %v100_v39  ;;  %v117_v0 = vld.sshfl [vmem:[#allocation1 + $0x18] sm:$0xff pattern:$0x73625140]  ;;  %v115_v1 = vld.sshfl [vmem:[#allocation1 + $0x8] sm:$0xff pattern:$0x73625140] }
  0x2b   :  { %561 = vmatpush.bf16.msra.mxu2 %v957_v48  ;;  %v135_v2 = vpack.c.bf16 %v117_v0, %v103_v42  ;;  %v133_v3 = vpack.c.bf16 %v115_v1, %v101_v40 }
  0x2c   :  { %575 = vmatpush.bf16.msra.mxu3 %v965_v49  ;;  %534 = vmatmul.bf16.vlgmr.msra.gmra.mxu0 %v132_v63 }
  0x2d   :  { %582 = vmatpush.bf16.msrb.mxu0 %v980_v46  ;;  %548 = vmatmul.bf16.vlgmr.msra.gmra.mxu1 %v133_v3  ;;  %v118_v13 = vld.sshfl [vmem:[#allocation1 + $0x20] sm:$0xff pattern:$0x73625140]  ;;  %v119_v15 = vld.sshfl [vmem:[#allocation1 + $0x28] sm:$0xff pattern:$0x73625140] }
  0x2e   :  { %596 = vmatpush.bf16.msrb.mxu1 %v988_v47  ;;  %562 = vmatmul.bf16.vlgmr.msra.gmra.mxu2 %v134_v62  ;;  %v136_v16 = vpack.c.bf16 %v118_v13, %v104_v53  ;;  %v137_v17 = vpack.c.bf16 %v119_v15, %v105_v54  ;;  %v1005_v54 = vld [vmem:[%s1188_s4] ss:$0 sm:$0xff] }
  0x2f   :  { %576 = vmatmul.bf16.vlgmr.msra.gmra.mxu3 %v135_v2  ;;  %681 = vmatpush.bf16.msrb.mxu2 %v996_v18 }
  0x31   :  { %583 = vmatpush.bf16.msrb.mxu0 %v979_v56 }
  0x32   :  { %597 = vmatpush.bf16.msrb.mxu1 %v987_v57 }
  0x33   :  { %682 = vmatpush.bf16.msrb.mxu2 %v995_v19 }
  0x35   :  { %584 = vmatpush.bf16.msrb.mxu0 %v978_v58 }
  0x36   :  { %598 = vmatpush.bf16.msrb.mxu1 %v986_v59 }
  0x37   :  { %683 = vmatpush.bf16.msrb.mxu2 %v994_v20 }
  0x39   :  { %585 = vmatpush.bf16.msrb.mxu0 %v977_v4 }
  0x3a   :  { %599 = vmatpush.bf16.msrb.mxu1 %v985_v5 }
  0x3b   :  { %684 = vmatpush.bf16.msrb.mxu2 %v993_v21 }
  0x3d   :  { %586 = vmatpush.bf16.msrb.mxu0 %v976_v6 }
  0x3e   :  { %600 = vmatpush.bf16.msrb.mxu1 %v984_v7 }
  0x3f   :  { %685 = vmatpush.bf16.msrb.mxu2 %v992_v22 }
  0x41   :  { %587 = vmatpush.bf16.msrb.mxu0 %v975_v8 }
  0x42   :  { %601 = vmatpush.bf16.msrb.mxu1 %v983_v9 }
  0x43   :  { %686 = vmatpush.bf16.msrb.mxu2 %v991_v23 }
  0x45   :  { %588 = vmatpush.bf16.msrb.mxu0 %v974_v10 }
  0x46   :  { %602 = vmatpush.bf16.msrb.mxu1 %v982_v11 }
  0x47   :  { %687 = vmatpush.bf16.msrb.mxu2 %v990_v24 }
  0x49   :  { %589 = vmatpush.bf16.msrb.mxu0 %v973_v12 }
  0x4a   :  { %603 = vmatpush.bf16.msrb.mxu1 %v981_v14 }
  0x4b   :  { %688 = vmatpush.bf16.msrb.mxu2 %v989_v26 }
  0x4c   :  { %590 = vmatmul.bf16.vlgmr.msrb.gmra.mxu0 %v136_v16 }
  0x4d   :  { %604 = vmatmul.bf16.vlgmr.msrb.gmra.mxu1 %v137_v17 }
  0xa9   :  { %v535_v25 = vpop.f32.mrf.mxu0 }
  0xaa   :  { %v549_v27 = vpop.f32.mrf.mxu1  ;;  %v536_v30 = vadd.f32 %v1004_v28, %v535_v25 }
  0xac   :  { %v550_v34 = vadd.f32 %v549_v27, %v536_v30 }
  0xb1   :  { %v563_v29 = vpop.f32.mrf.mxu2  ;;  %v537_v31 = vpop.f32.mrf.mxu0 }
  0xb2   :  { %v551_v32 = vpop.f32.mrf.mxu1  ;;  %v577_v33 = vpop.f32.mrf.mxu3  ;;  %v538_v35 = vadd.f32 %v1004_v28, %v537_v31  ;;  %v564_v36 = vadd.f32 %v563_v29, %v550_v34 }
  0xb4   :  { %v552_v37 = vadd.f32 %v551_v32, %v538_v35  ;;  %v578_v41 = vadd.f32 %v577_v33, %v564_v36 }
  0xb9   :  { %v565_v38 = vpop.f32.mrf.mxu2 }
  0xba   :  { %v566_v42 = vadd.f32 %v565_v38, %v552_v37  ;;  %v579_v43 = vpop.f32.mrf.mxu3 }
  0xbc   :  { %v580_v45 = vadd.f32 %v579_v43, %v566_v42 }
  0xc9   :  { %v591_v39 = vpop.f32.mrf.mxu0 }
  0xca   :  { %v605_v40 = vpop.f32.mrf.mxu1  ;;  %v592_v44 = vadd.f32 %v591_v39, %v578_v41 }
  0xcc   :  { %v606_v47 = vadd.f32 %v605_v40, %v592_v44 }
  0xce   :  { %v610_v51 = vmax.f32 %v606_v47, 0.0 }
  0xd1   :  { %v593_v46 = vpop.f32.mrf.mxu0 }
  0xd2   :  { %v594_v48 = vadd.f32 %v593_v46, %v580_v45  ;;  %v607_v49 = vpop.f32.mrf.mxu1 }
  0xd4   :  { %v608_v50 = vadd.f32 %v607_v49, %v594_v48 }
  0xd6   :  { %v611_v52 = vmax.f32 %v608_v50, 0.0 }
  0xd8   :  { %v612_v53 = vpack.c.bf16 %v611_v52, %v610_v51 }
  0xda   :  { %689 = vmatmul.bf16.vlgmr.msrb.gmra.mxu2 %v612_v53 }
 0x15d   :  { %v690_v55 = vpop.f32.mrf.mxu2 }
 0x15e   :  { %v691_v56 = vadd.f32 %v1005_v54, %v690_v55 }
 0x160   :  { %695 = vst [vmem:[#allocation7] sm:$0xff] %v691_v56 }
 0x165   :  { %v692_v57 = vpop.f32.mrf.mxu2 }
 0x166   :  { %v693_v58 = vadd.f32 %v1005_v54, %v692_v57 }
 0x168   :  { %696 = vst [vmem:[#allocation7 + $0x8] sm:$0xff] %v693_v58 }
 0x169   :  { %700 = vsyncadd [#allocation4], 224  ;;  %s703_s12 = sshll.u32 %s1189_s5, 4  ;;  %s1088_s13 = smov [#allocation7]   ;;  %s704_s12 = int_to_ptr.hbm [resolvable:$true] %s703_s12 }
 0x16a   :  { %s701_s14 = sshll.u32 %s1088_s13, 4  ;;  %s1089_s15 = smov 32   ;;  %s702_s14 = int_to_ptr.vmem [resolvable:$true] %s701_s14 }
 0x16b   :  { %s1090_s16 = smov 2  }
 0x16c   :  { %709 = dma.vmem_to_hbm [thread:$0]  %s702_s14, 32, %s704_s12, [#allocation4], %s1089_s15, %s1089_s15, %s1090_s16  }
 0x16d   :  { %1082 = dma.done.wait [#allocation4], 256  }
 0x16e   :  { %1083 = vsyncadd [#allocation4], 4294967040 }
 0x16f   :  { %714 = vsyncpa [#allocation3], 1 }
 0x170   :  { %715 = vsyncpa [#allocation6], 1 }
 0x171   :  { %716 = vsyncpa [#allocation4], 1 }

</bundles_post_ra>
